<compile_context>
chip_gen: v7x
topology: tpu7x:2x2x1
jax: 0.10.0
libtpu: 0.0.40
codegen_flags: <defaults>
</compile_context>

<pallas_src>
import functools

import jax
import jax.numpy as jnp
from jax.experimental import pallas as pl
from jax.experimental.pallas import tpu as pltpu


def _round_up(x, m):
    return ((x + m - 1) // m) * m


def _ntn_kernel(x_ref, a_ref, o_ref, *, f3, t):
    """Fused Neural-Tensor-Network scoring for one batch tile.

    x_ref : VMEM (K_PAD, Bt)       stacked [e1; e2; ones; zeros] columns
    a_ref : VMEM (F3*T + T, K_PAD) fused weight [[Wp|0|0],[Wb|bias]] (VMEM resident)
    o_ref : VMEM (T, Bt)           relu(scoring + block_scoring + bias)
    """
    x = x_ref[...]                                                   # (K_PAD, Bt)

    # One MXU matmul: rows 0..F3*T-1 give the bilinear stage-1 result,
    # rows F3*T.. give Wb @ [e1;e2] + bias (bias folded via the ones row).
    y = jnp.dot(a_ref[...], x, preferred_element_type=jnp.float32)  # (F3*T+T, Bt)
    m = y[: f3 * t, :]                                               # (F3*T, Bt)
    blk = y[f3 * t:, :]                                              # (T, Bt)

    # Bilinear stage 2 on the VPU: scoring[t,b] = sum_j m[j*T+t, b] * e2[j, b].
    # (F3*T,Bt)->(F3,T,Bt) is layout-free (T multiple of 8 sublanes); the reduce
    # over the leading axis is plain vreg adds.
    e2 = x[f3: 2 * f3, :]                                            # (F3, Bt)
    scoring = jnp.sum(m.reshape(f3, t, -1) * e2[:, None, :], axis=0)  # (T, Bt)

    o_ref[...] = jnp.maximum(scoring + blk, 0.0)


def make_fused_weight(weight_matrix, weight_matrix_block, bias):
    """Build the fused, lane-dense weight ONCE (hoisted out of the forward call).

    weight_matrix       : (F3, F3, T)
    weight_matrix_block : (T, 2*F3)
    bias                : (T, 1)
    returns             : (F3*T + T, K_PAD) f32, K_PAD = round_up(2*F3+1, 128)
    """
    f3, _, t = weight_matrix.shape
    k_pad = _round_up(2 * f3 + 1, 128)

    # Wp[j*T + t, i] = W[i, j, t]  (matches torch's W.view(F3, -1) flattening)
    wp = weight_matrix.reshape(f3, f3 * t).T.astype(jnp.float32)          # (F3*T, F3)
    top = jnp.zeros((f3 * t, k_pad), jnp.float32).at[:, :f3].set(wp)
    bot = (jnp.zeros((t, k_pad), jnp.float32)
           .at[:, : 2 * f3].set(weight_matrix_block.astype(jnp.float32))
           .at[:, 2 * f3: 2 * f3 + 1].set(bias.astype(jnp.float32)))
    return jnp.concatenate([top, bot], axis=0)                            # (F3*T+T, K_PAD)


@jax.jit
def tensor_network_forward(embedding_1, embedding_2, fused_weight):
    """Batched TensorNetworkModule.forward.

    embedding_1, embedding_2 : (F3, B)   B graph pairs as columns (B=1 == torch module)
    fused_weight             : output of make_fused_weight()
    returns                  : (T, B)
    """
    f3, b = embedding_1.shape
    m_rows, k_pad = fused_weight.shape
    t = m_rows // (f3 + 1)                     # m_rows = F3*T + T

    # Adaptive batch tile: 128-wide for small/single-pair calls, <=512 otherwise.
    batch_tile = min(max(_round_up(b, 128), 128), 512)
    n_tiles = pl.cdiv(b, batch_tile)
    b_pad = n_tiles * batch_tile

    # Stacked input [e1; e2; ones; zeros] -> (K_PAD, B_pad).  Fuses under jit.
    x = jnp.concatenate(
        [embedding_1.astype(jnp.float32),
         embedding_2.astype(jnp.float32),
         jnp.ones((1, b), jnp.float32)], axis=0)
    x = jnp.pad(x, ((0, k_pad - x.shape[0]), (0, b_pad - b)))

    out = pl.pallas_call(
        functools.partial(_ntn_kernel, f3=f3, t=t),
        out_shape=jax.ShapeDtypeStruct((t, b_pad), jnp.float32),
        grid=(n_tiles,),
        in_specs=[
            pl.BlockSpec((k_pad, batch_tile), lambda i: (0, i)),   # x tile
            pl.BlockSpec((m_rows, k_pad), lambda i: (0, 0)),       # fused weight (resident)
        ],
        out_specs=pl.BlockSpec((t, batch_tile), lambda i: (0, i)),
        compiler_params=pltpu.CompilerParams(
            dimension_semantics=("parallel",)),   # v7x: shard batch tiles across 2 TCs
    )(x, fused_weight)

    return out[:, :b]


def xavier_uniform(key, shape):
    """Deterministic xavier_uniform_ matching torch's fan computation."""
    if len(shape) == 2:
        fan_out, fan_in = shape[0], shape[1]
    else:
        receptive = 1
        for d in shape[2:]:
            receptive *= d
        fan_in = shape[1] * receptive
        fan_out = shape[0] * receptive
    bound = (6.0 / (fan_in + fan_out)) ** 0.5
    return jax.random.uniform(key, shape, jnp.float32, -bound, bound)


if __name__ == "__main__":
    FILTERS_3 = 32        # args.filters_3
    TENSOR_NEURONS = 16   # args.tensor_neurons
    BATCH = 4             # small batch of graph pairs

    key = jax.random.PRNGKey(0)
    k1, k2, k3, k4, k5 = jax.random.split(key, 5)

    weight_matrix = xavier_uniform(k1, (FILTERS_3, FILTERS_3, TENSOR_NEURONS))
    weight_matrix_block = xavier_uniform(k2, (TENSOR_NEURONS, 2 * FILTERS_3))
    bias = xavier_uniform(k3, (TENSOR_NEURONS, 1))

    embedding_1 = jax.random.normal(k4, (FILTERS_3, BATCH), dtype=jnp.float32)
    embedding_2 = jax.random.normal(k5, (FILTERS_3, BATCH), dtype=jnp.float32)

    # Parameter re-layout happens once, outside the per-call path.
    fused = jax.block_until_ready(
        make_fused_weight(weight_matrix, weight_matrix_block, bias))

    scores = tensor_network_forward(embedding_1, embedding_2, fused)
    scores = jax.block_until_ready(scores)

    # Pure-JAX reference mirroring the torch forward exactly (per column).
    sc = jnp.einsum('ijt,ib,jb->tb', weight_matrix, embedding_1, embedding_2)
    blk = weight_matrix_block @ jnp.concatenate([embedding_1, embedding_2], axis=0)
    ref = jnp.maximum(sc + blk + bias, 0.0)

    assert scores.shape == (TENSOR_NEURONS, BATCH), scores.shape
    assert jnp.allclose(scores, ref, atol=1e-4, rtol=1e-4), \
        float(jnp.max(jnp.abs(scores - ref)))

    # Single-pair call: identical semantics to the torch module ((F3,1) -> (T,1)).
    single = tensor_network_forward(embedding_1[:, :1], embedding_2[:, :1], fused)
    single = jax.block_until_ready(single)
    assert single.shape == (TENSOR_NEURONS, 1), single.shape
    assert jnp.allclose(single, ref[:, :1], atol=1e-4, rtol=1e-4)

    print("KERNEL_OK")
</pallas_src>

<mosaic_0001>
module attributes {stable_mosaic.version = 11 : i64} {
  func.func @_ntn_kernel(%arg0: i32, %arg1: memref<128x128xf32, #tpu.memory_space<vmem>>, %arg2: memref<528x128xf32, #tpu.memory_space<vmem>>, %arg3: memref<16x128xf32, #tpu.memory_space<vmem>>) attributes {dimension_semantics = [#tpu.dimension_semantics<parallel>], iteration_bounds = array<i64: 1>, scalar_prefetch = 0 : i64, scratch_operands = 0 : i64, tpu.core_type = #tpu.core_type<tc>, window_params = [{transform_indices = @transform_0, window_bounds = array<i64: 128, 128>}, {pipeline_mode = #tpu.pipeline_mode<synchronous>, transform_indices = @transform_1, window_bounds = array<i64: 528, 128>}, {transform_indices = @transform_2, window_bounds = array<i64: 16, 128>}]} {
    %c0 = arith.constant 0 : index
    %c0_0 = arith.constant 0 : index
    %0 = vector.load %arg1[%c0, %c0_0] : memref<128x128xf32, #tpu.memory_space<vmem>>, vector<128x128xf32>
    %c0_1 = arith.constant 0 : index
    %c0_2 = arith.constant 0 : index
    %1 = vector.load %arg2[%c0_1, %c0_2] : memref<528x128xf32, #tpu.memory_space<vmem>>, vector<528x128xf32>
    %cst = arith.constant dense<0.000000e+00> : vector<528x128xf32>
    %2 = tpu.matmul %1, %0, %cst {dimension_numbers = #tpu.dot_dimension_numbers<[1], [0], [0], [1], [0, 0, 1, 1], [], []>} : vector<528x128xf32>, vector<128x128xf32>, vector<528x128xf32> -> vector<528x128xf32>
    %3 = vector.extract_strided_slice %2 {offsets = [0, 0], sizes = [512, 128], strides = [1, 1]} : vector<528x128xf32> to vector<512x128xf32>
    %4 = vector.extract_strided_slice %2 {offsets = [512, 0], sizes = [16, 128], strides = [1, 1]} : vector<528x128xf32> to vector<16x128xf32>
    %5 = vector.extract_strided_slice %0 {offsets = [32, 0], sizes = [32, 128], strides = [1, 1]} : vector<128x128xf32> to vector<32x128xf32>
    %6 = vector.shape_cast %3 : vector<512x128xf32> to vector<32x16x128xf32>
    %7 = vector.shape_cast %5 : vector<32x128xf32> to vector<32x1x128xf32>
    %8 = vector.broadcast %7 : vector<32x1x128xf32> to vector<32x16x128xf32>
    %9 = arith.mulf %6, %8 : vector<32x16x128xf32>
    %cst_3 = arith.constant dense<0.000000e+00> : vector<16x128xf32>
    %10 = vector.multi_reduction <add>, %9, %cst_3 [0] : vector<32x16x128xf32> to vector<16x128xf32>
    %11 = arith.addf %10, %4 : vector<16x128xf32>
    %cst_4 = arith.constant 0.000000e+00 : f32
    %12 = vector.broadcast %cst_4 : f32 to vector<16x128xf32>
    %13 = arith.maximumf %11, %12 : vector<16x128xf32>
    %c0_5 = arith.constant 0 : index
    %c0_6 = arith.constant 0 : index
    %14 = vector.load %arg3[%c0_5, %c0_6] : memref<16x128xf32, #tpu.memory_space<vmem>>, vector<16x128xf32>
    tpu.vector_store %arg3[%c0_5, %c0_6], %13 {strides = array<i32>} : memref<16x128xf32, #tpu.memory_space<vmem>>, vector<16x128xf32>,
    return
  }
  func.func @transform_0(%arg0: i32) -> (i32, i32) {
    %c0_i32 = arith.constant 0 : i32
    %c0_i32_0 = arith.constant 0 : i32
    return %c0_i32, %arg0 : i32, i32
  }
  func.func @transform_1(%arg0: i32) -> (i32, i32) {
    %c0_i32 = arith.constant 0 : i32
    %c0_i32_0 = arith.constant 0 : i32
    %c0_i32_1 = arith.constant 0 : i32
    return %c0_i32, %c0_i32_0 : i32, i32
  }
  func.func @transform_2(%arg0: i32) -> (i32, i32) {
    %c0_i32 = arith.constant 0 : i32
    %c0_i32_0 = arith.constant 0 : i32
    return %c0_i32, %arg0 : i32, i32
  }
}

</mosaic_0001>

<bundles_post_ra>
// kernel: tensor_network_forward.1
= control target key start
LH: loop header
LB: loop body
LE: loop exit
PB: predicated region body
PF: predicated region fallthrough
CT: control target
= control target key end

     0   :  { %7 = vsyncpa [#allocation3], 0  ;;  %s1292_s9 = smov [#allocation2]   ;;  %s1557_s0 = inlined_call_operand.vmem [shape: f32[128,128], index: 0, kind: input, shape index: {}]   ;;  %s1558_s1 = inlined_call_operand.hbm [shape: f32[528,128], index: 1, kind: input, shape index: {}]   ;;  %s1559_s2 = inlined_call_operand.vmem [shape: f32[16,128], index: 2, kind: output, shape index: {}]  }
   0x1   :  { %s15_s10 = sshll.u32 %s1292_s9, 4  ;;  %s1268_s13 = scalar_lea.hbm %s1558_s1, 8448  ;;  %s16_s10 = int_to_ptr.vmem [resolvable:$true] %s15_s10 }
   0x2   :  { %p1269_p0 = scmp.ne.s32.totalorder %s1558_s1, %s1268_s13  ;;  %p1272_p1 = scmp.lt.u32.totalorder %s1268_s13, %s1558_s1 }
   0x4   :  { %p1274_p2 = pnand %p1272_p1, %p1269_p0 }
   0x6   :  { %1277 = shalt.err (!%p1274_p2)
}
   0x7   :  { %s1278_s18 = scalar_lea.vmem %s16_s10, 8448  ;;  %p1283_p4 = scmp.lt.s32.totalorder %s16_s10, %s16_s10 }
   0x8   :  { %p1279_p3 = scmp.ne.s32.totalorder %s16_s10, %s1278_s18  ;;  %p1284_p5 = scmp.lt.s32.totalorder %s1278_s18, %s1278_s18 }
   0xa   :  { %p1285_p6 = por %p1284_p5, %p1283_p4 }
   0xc   :  { %p1286_p7 = pnand %p1285_p6, %p1279_p3 }
   0xe   :  { %1289 = shalt.err (!%p1286_p7)
}
   0xf   :  { %s1293_s19 = smov 128   ;;  %s1294_s20 = smov 8  }
  0x10   :  { %21 = dma.hbm_to_vmem [thread:$0]  %s1558_s1, 8448, %s16_s10, [#allocation3], %s1293_s19, %s1293_s19, %s1294_s20  }
  0x11   :  { %1290 = dma.done.wait [#allocation3], 8448  }
  0x12   :  { %1291 = vsyncadd [#allocation3], 4294958848  ;;  %v25_v0 = vld [vmem:[%s1557_s0] sm:$0xff]  ;;  %v26_v1 = vld [vmem:[%s1557_s0 + $0x8] sm:$0xff] }
  0x13   :  { %v27_v2 = vld [vmem:[%s1557_s0 + $0x10] sm:$0xff]  ;;  %v1212_v3 = vpack.c.bf16 %v26_v1, %v25_v0  ;;  %v28_v4 = vld [vmem:[%s1557_s0 + $0x18] sm:$0xff]  ;;  %v1338_v6 = vld [vmem:[%s1557_s0 + $0x20] sm:$0xff] }
  0x14   :  { %v1216_v5 = vpack.c.bf16 %v28_v4, %v27_v2  ;;  %v1343_v7 = vld [vmem:[%s1557_s0 + $0x28] sm:$0xff]  ;;  %v41_v9 = vld [vmem:[#allocation2] sm:$0xff]  ;;  %v1350_v10 = vld [vmem:[%s1557_s0 + $0x30] sm:$0xff] }
  0x15   :  { %1213 = vmatprep.subr.bf16.mxu0 %v1212_v3  ;;  %1244 = vmatprep.subr.bf16.mxu1 %v1212_v3  ;;  %v1220_v8 = vpack.c.bf16 %v1343_v7, %v1338_v6  ;;  %v1355_v11 = vld [vmem:[%s1557_s0 + $0x38] sm:$0xff]  ;;  %v33_v13 = vld [vmem:[%s1557_s0 + $0x40] sm:$0xff]  ;;  %v34_v14 = vld [vmem:[%s1557_s0 + $0x48] sm:$0xff] }
  0x16   :  { %1215 = vmatpush3.bf16.msra.mxu0 %v1212_v3  ;;  %1252 = vmatpush3.bf16.msra.mxu1 %v1212_v3  ;;  %v1224_v12 = vpack.c.bf16 %v1355_v11, %v1350_v10  ;;  %v75_v15 = vld [vmem:[#allocation2 + $0x110] sm:$0xff]  ;;  %v1228_v16 = vpack.c.bf16 %v34_v14, %v33_v13  ;;  %v36_v18 = vld [vmem:[%s1557_s0 + $0x58] sm:$0xff]  ;;  %v37_v20 = vld [vmem:[%s1557_s0 + $0x60] sm:$0xff] }
  0x17   :  { %1217 = vmatprep.subr.bf16.mxu0 %v1216_v5  ;;  %1245 = vmatprep.subr.bf16.mxu1 %v1216_v5  ;;  %v35_v17 = vld [vmem:[%s1557_s0 + $0x50] sm:$0xff]  ;;  %v38_v21 = vld [vmem:[%s1557_s0 + $0x68] sm:$0xff]  ;;  %v40_v24 = vld [vmem:[%s1557_s0 + $0x78] sm:$0xff] }
  0x18   :  { %1113 = vmatprep.mubr.f32.mxu0 %v41_v9  ;;  %1164 = vmatprep.mubr.f32.mxu1 %v75_v15  ;;  %v1232_v19 = vpack.c.bf16 %v36_v18, %v35_v17  ;;  %v1236_v22 = vpack.c.bf16 %v38_v21, %v37_v20  ;;  %v39_v23 = vld [vmem:[%s1557_s0 + $0x70] sm:$0xff]  ;;  %v42_v26 = vld [vmem:[#allocation2 + $0x8] sm:$0xff]  ;;  %v76_v27 = vld [vmem:[#allocation2 + $0x118] sm:$0xff] }
  0x19   :  { %v1240_v25 = vpack.c.bf16 %v40_v24, %v39_v23  ;;  %v43_v28 = vld [vmem:[#allocation2 + $0x10] sm:$0xff]  ;;  %v77_v29 = vld [vmem:[#allocation2 + $0x120] sm:$0xff]  ;;  %v44_v30 = vld [vmem:[#allocation2 + $0x18] sm:$0xff] }
  0x1a   :  { %1219 = vmatpush3.bf16.msra.mxu0 %v1216_v5  ;;  %1253 = vmatpush3.bf16.msra.mxu1 %v1216_v5  ;;  %v78_v31 = vld [vmem:[#allocation2 + $0x128] sm:$0xff]  ;;  %v45_v32 = vld [vmem:[#allocation2 + $0x20] sm:$0xff]  ;;  %v79_v33 = vld [vmem:[#allocation2 + $0x130] sm:$0xff] }
  0x1b   :  { %1221 = vmatprep.subr.bf16.mxu0 %v1220_v8  ;;  %1246 = vmatprep.subr.bf16.mxu1 %v1220_v8  ;;  %v46_v34 = vld [vmem:[#allocation2 + $0x28] sm:$0xff]  ;;  %v80_v35 = vld [vmem:[#allocation2 + $0x138] sm:$0xff]  ;;  %v47_v36 = vld [vmem:[#allocation2 + $0x30] sm:$0xff] }
  0x1c   :  { %v81_v37 = vld [vmem:[#allocation2 + $0x140] sm:$0xff]  ;;  %v48_v38 = vld [vmem:[#allocation2 + $0x38] sm:$0xff]  ;;  %v82_v39 = vld [vmem:[#allocation2 + $0x148] sm:$0xff] }
  0x1d   :  { %v49_v40 = vld [vmem:[#allocation2 + $0x40] sm:$0xff]  ;;  %v83_v41 = vld [vmem:[#allocation2 + $0x150] sm:$0xff]  ;;  %v50_v42 = vld [vmem:[#allocation2 + $0x48] sm:$0xff] }
  0x1e   :  { %1223 = vmatpush3.bf16.msra.mxu0 %v1220_v8  ;;  %1254 = vmatpush3.bf16.msra.mxu1 %v1220_v8  ;;  %v84_v43 = vld [vmem:[#allocation2 + $0x158] sm:$0xff]  ;;  %v51_v44 = vld [vmem:[#allocation2 + $0x50] sm:$0xff]  ;;  %v85_v45 = vld [vmem:[#allocation2 + $0x160] sm:$0xff] }
  0x1f   :  { %1225 = vmatprep.subr.bf16.mxu0 %v1224_v12  ;;  %1247 = vmatprep.subr.bf16.mxu1 %v1224_v12  ;;  %v52_v46 = vld [vmem:[#allocation2 + $0x58] sm:$0xff]  ;;  %v86_v47 = vld [vmem:[#allocation2 + $0x168] sm:$0xff]  ;;  %v53_v48 = vld [vmem:[#allocation2 + $0x60] sm:$0xff] }
  0x20   :  { %v87_v49 = vld [vmem:[#allocation2 + $0x170] sm:$0xff]  ;;  %v54_v50 = vld [vmem:[#allocation2 + $0x68] sm:$0xff]  ;;  %v88_v51 = vld [vmem:[#allocation2 + $0x178] sm:$0xff] }
  0x21   :  { %v55_v52 = vld [vmem:[#allocation2 + $0x70] sm:$0xff]  ;;  %v89_v53 = vld [vmem:[#allocation2 + $0x180] sm:$0xff]  ;;  %v56_v54 = vld [vmem:[#allocation2 + $0x78] sm:$0xff] }
  0x22   :  { %1227 = vmatpush3.bf16.msra.mxu0 %v1224_v12  ;;  %1255 = vmatpush3.bf16.msra.mxu1 %v1224_v12  ;;  %v90_v55 = vld [vmem:[#allocation2 + $0x188] sm:$0xff]  ;;  %v57_v56 = vld [vmem:[#allocation2 + $0x80] sm:$0xff]  ;;  %v91_v57 = vld [vmem:[#allocation2 + $0x190] sm:$0xff] }
  0x23   :  { %1229 = vmatprep.subr.bf16.mxu0 %v1228_v16  ;;  %1248 = vmatprep.subr.bf16.mxu1 %v1228_v16  ;;  %v58_v58 = vld [vmem:[#allocation2 + $0x88] sm:$0xff]  ;;  %v92_v59 = vld [vmem:[#allocation2 + $0x198] sm:$0xff]  ;;  %v59_v60 = vld [vmem:[#allocation2 + $0x90] sm:$0xff] }
  0x24   :  { %v93_v61 = vld [vmem:[#allocation2 + $0x1a0] sm:$0xff]  ;;  %v60_v62 = vld [vmem:[#allocation2 + $0x98] sm:$0xff]  ;;  %v94_v63 = vld [vmem:[#allocation2 + $0x1a8] sm:$0xff] }
  0x25   :  { %v61_v0 = vld [vmem:[#allocation2 + $0xa0] sm:$0xff]  ;;  %v95_v1 = vld [vmem:[#allocation2 + $0x1b0] sm:$0xff]  ;;  %v62_v2 = vld [vmem:[#allocation2 + $0xa8] sm:$0xff] }
  0x26   :  { %1231 = vmatpush3.bf16.msra.mxu0 %v1228_v16  ;;  %1256 = vmatpush3.bf16.msra.mxu1 %v1228_v16  ;;  %v96_v3 = vld [vmem:[#allocation2 + $0x1b8] sm:$0xff]  ;;  %v63_v4 = vld [vmem:[#allocation2 + $0xb0] sm:$0xff]  ;;  %v97_v5 = vld [vmem:[#allocation2 + $0x1c0] sm:$0xff] }
  0x27   :  { %1233 = vmatprep.subr.bf16.mxu0 %v1232_v19  ;;  %1249 = vmatprep.subr.bf16.mxu1 %v1232_v19  ;;  %v64_v8 = vld [vmem:[#allocation2 + $0xb8] sm:$0xff]  ;;  %v98_v9 = vld [vmem:[#allocation2 + $0x1c8] sm:$0xff]  ;;  %v65_v12 = vld [vmem:[#allocation2 + $0xc0] sm:$0xff] }
  0x28   :  { %v99_v13 = vld [vmem:[#allocation2 + $0x1d0] sm:$0xff]  ;;  %v66_v14 = vld [vmem:[#allocation2 + $0xc8] sm:$0xff]  ;;  %v100_v15 = vld [vmem:[#allocation2 + $0x1d8] sm:$0xff] }
  0x29   :  { %v67_v16 = vld [vmem:[#allocation2 + $0xd0] sm:$0xff]  ;;  %v101_v17 = vld [vmem:[#allocation2 + $0x1e0] sm:$0xff]  ;;  %v68_v18 = vld [vmem:[#allocation2 + $0xd8] sm:$0xff] }
  0x2a   :  { %1235 = vmatpush3.bf16.msra.mxu0 %v1232_v19  ;;  %1257 = vmatpush3.bf16.msra.mxu1 %v1232_v19  ;;  %v102_v19 = vld [vmem:[#allocation2 + $0x1e8] sm:$0xff]  ;;  %v69_v20 = vld [vmem:[#allocation2 + $0xe0] sm:$0xff]  ;;  %v103_v21 = vld [vmem:[#allocation2 + $0x1f0] sm:$0xff] }
  0x2b   :  { %1237 = vmatprep.subr.bf16.mxu0 %v1236_v22  ;;  %1250 = vmatprep.subr.bf16.mxu1 %v1236_v22  ;;  %v104_v23 = vld [vmem:[#allocation2 + $0x1f8] sm:$0xff]  ;;  %v71_v24 = vld [vmem:[#allocation2 + $0xf0] sm:$0xff] }
  0x2e   :  { %1239 = vmatpush3.bf16.msra.mxu0 %v1236_v22  ;;  %1258 = vmatpush3.bf16.msra.mxu1 %v1236_v22  ;;  %v70_v22 = vld [vmem:[#allocation2 + $0xe8] sm:$0xff] }
  0x2f   :  { %1241 = vmatprep.subr.bf16.mxu0 %v1240_v25  ;;  %1251 = vmatprep.subr.bf16.mxu1 %v1240_v25 }
  0x32   :  { %1243 = vmatpush3.bf16.msra.mxu0 %v1240_v25  ;;  %1259 = vmatpush3.bf16.msra.mxu1 %v1240_v25  ;;  %v105_v25 = vld [vmem:[#allocation2 + $0x200] sm:$0xff] }
  0x35   :  { %1114 = vmatmul.mubr.f32.vlgmr.msra.gmra.mrb[0].mxu0 %v42_v26  ;;  %1165 = vmatmul.mubr.f32.vlgmr.msra.gmra.mrb[0].mxu1 %v76_v27  ;;  %v72_v26 = vld [vmem:[#allocation2 + $0xf8] sm:$0xff]  ;;  %v106_v27 = vld [vmem:[#allocation2 + $0x208] sm:$0xff] }
  0x36   :  { %1116 = vmatprep.mubr.f32.mxu0 %v43_v28  ;;  %1167 = vmatprep.mubr.f32.mxu1 %v77_v29  ;;  %v73_v28 = vld [vmem:[#allocation2 + $0x100] sm:$0xff]  ;;  %v74_v29 = vld [vmem:[#allocation2 + $0x108] sm:$0xff] }
  0x39   :  { %1117 = vmatmul.mubr.f32.gmra.mrb[2].mxu0 %v44_v30  ;;  %1168 = vmatmul.mubr.f32.gmra.mrb[2].mxu1 %v78_v31  ;;  %v1295_v30 = vmov 1966171168  }
  0x3a   :  { %1119 = vmatprep.mubr.f32.mxu0 %v45_v32  ;;  %1170 = vmatprep.mubr.f32.mxu1 %v79_v33  ;;  %v508_v31 = vunpack.c.l.s4 %v1295_v30  ;;  %v510_v32 = vlaneseq }
  0x3c   :  { %v509_v33 = vunpack.c.0.s8 %v508_v31 }
  0x3d   :  { %1120 = vmatmul.mubr.f32.gmra.mrb[4].mxu0 %v46_v34  ;;  %1171 = vmatmul.mubr.f32.gmra.mrb[4].mxu1 %v80_v35  ;;  %v511_v34 = vshrl.u32 %v510_v32, 7 }
  0x3e   :  { %1122 = vmatprep.mubr.f32.mxu0 %v47_v36  ;;  %1173 = vmatprep.mubr.f32.mxu1 %v81_v37 }
  0x3f   :  { %v1383_v35 = vsub.s32 %v509_v33, %v511_v34 }
  0x41   :  { %1123 = vmatmul.mubr.f32.gmra.mrb[6].mxu0 %v48_v38  ;;  %1174 = vmatmul.mubr.f32.gmra.mrb[6].mxu1 %v82_v39  ;;  %v513_v36 = vrot.slane %v1338_v6, %v1383_v35  ;;  %v1388_v39 = vsub.s32 0, %v511_v34 }
  0x42   :  { %1125 = vmatprep.mubr.f32.mxu0 %v49_v40  ;;  %1176 = vmatprep.mubr.f32.mxu1 %v83_v41 }
  0x43   :  { %v521_v37 = vcombine.high %v513_v36, %v513_v36  ;;  %v529_v38 = vrot.slane %v513_v36, %v1383_v35 }
  0x45   :  { %1126 = vmatmul.mubr.f32.gmra.mrb[8].mxu0 %v50_v42  ;;  %1177 = vmatmul.mubr.f32.gmra.mrb[8].mxu1 %v84_v43  ;;  %v543_v40 = vrot.slane %v521_v37, %v1383_v35  ;;  %v551_v42 = vcombine.high %v529_v38, %v529_v38 }
  0x46   :  { %1128 = vmatprep.mubr.f32.mxu0 %v51_v44  ;;  %1179 = vmatprep.mubr.f32.mxu1 %v85_v45  ;;  %v705_v44 = vrot.slane %v529_v38, %v1388_v39 }
  0x49   :  { %1129 = vmatmul.mubr.f32.gmra.mrb[10].mxu0 %v52_v46  ;;  %1180 = vmatmul.mubr.f32.gmra.mrb[10].mxu1 %v86_v47  ;;  %v709_v46 = vrot.slane %v543_v40, %v1388_v39  ;;  %v506_v47 = vcombine.high %v1338_v6, %v1338_v6 }
  0x4a   :  { %1131 = vmatprep.mubr.f32.mxu0 %v53_v48  ;;  %1182 = vmatprep.mubr.f32.mxu1 %v87_v49 }
  0x4d   :  { %1132 = vmatmul.mubr.f32.gmra.mrb[12].mxu0 %v54_v50  ;;  %1183 = vmatmul.mubr.f32.gmra.mrb[12].mxu1 %v88_v51  ;;  %v713_v50 = vrot.slane %v551_v42, %v1388_v39 }
  0x4e   :  { %1134 = vmatprep.mubr.f32.mxu0 %v55_v52  ;;  %1185 = vmatprep.mubr.f32.mxu1 %v89_v53 }
  0x51   :  { %1135 = vmatmul.mubr.f32.gmra.mrb[14].mxu0 %v56_v54  ;;  %1186 = vmatmul.mubr.f32.gmra.mrb[14].mxu1 %v90_v55  ;;  %v553_v55 = vcombine.high %v543_v40, %v543_v40  ;;  %v562_v40 = vrot.slane %v1343_v7, %v1383_v35 }
  0x52   :  { %1137 = vmatprep.mubr.f32.mxu0 %v57_v56  ;;  %1188 = vmatprep.mubr.f32.mxu1 %v91_v57  ;;  %v520_v56 = vrot.slane %v506_v47, %v1383_v35 }
  0x55   :  { %1138 = vmatmul.mubr.f32.gmra.mrb[16].mxu0 %v58_v58  ;;  %1189 = vmatmul.mubr.f32.gmra.mrb[16].mxu1 %v92_v59 }
  0x56   :  { %1140 = vmatprep.mubr.f32.mxu0 %v59_v60  ;;  %1191 = vmatprep.mubr.f32.mxu1 %v93_v61 }
  0x59   :  { %1141 = vmatmul.mubr.f32.gmra.mrb[18].mxu0 %v60_v62  ;;  %1192 = vmatmul.mubr.f32.gmra.mrb[18].mxu1 %v94_v63 }
  0x5a   :  { %1143 = vmatprep.mubr.f32.mxu0 %v61_v0  ;;  %1194 = vmatprep.mubr.f32.mxu1 %v95_v1  ;;  %v717_v1 = vrot.slane %v553_v55, %v1388_v39 }
  0x5d   :  { %1144 = vmatmul.mubr.f32.gmra.mrb[20].mxu0 %v62_v2  ;;  %1195 = vmatmul.mubr.f32.gmra.mrb[20].mxu1 %v96_v3  ;;  %v536_v2 = vrot.slane %v520_v56, %v1383_v35  ;;  %v522_v3 = vcombine.high %v520_v56, %v520_v56 }
  0x5e   :  { %1146 = vmatprep.mubr.f32.mxu0 %v63_v4  ;;  %1197 = vmatprep.mubr.f32.mxu1 %v97_v5 }
  0x61   :  { %1147 = vmatmul.mubr.f32.gmra.mrb[22].mxu0 %v64_v8  ;;  %1198 = vmatmul.mubr.f32.gmra.mrb[22].mxu1 %v98_v9 }
  0x62   :  { %1149 = vmatprep.mubr.f32.mxu0 %v65_v12  ;;  %1200 = vmatprep.mubr.f32.mxu1 %v99_v13 }
  0x65   :  { %1150 = vmatmul.mubr.f32.gmra.mrb[24].mxu0 %v66_v14  ;;  %1201 = vmatmul.mubr.f32.gmra.mrb[24].mxu1 %v100_v15 }
  0x66   :  { %1152 = vmatprep.mubr.f32.mxu0 %v67_v16  ;;  %1203 = vmatprep.mubr.f32.mxu1 %v101_v17  ;;  %v721_v16 = vrot.slane %v536_v2, %v1388_v39  ;;  %v550_v17 = vrot.slane %v522_v3, %v1383_v35 }
  0x68   :  { %v554_v38 = vcombine.high %v550_v17, %v550_v17 }
  0x69   :  { %1153 = vmatmul.mubr.f32.gmra.mrb[26].mxu0 %v68_v18  ;;  %1204 = vmatmul.mubr.f32.gmra.mrb[26].mxu1 %v102_v19 }
  0x6a   :  { %1155 = vmatprep.mubr.f32.mxu0 %v69_v20  ;;  %1206 = vmatprep.mubr.f32.mxu1 %v103_v21 }
  0x6d   :  { %1156 = vmatmul.mubr.f32.gmra.mrb[28].mxu0 %v70_v22  ;;  %1207 = vmatmul.mubr.f32.gmra.mrb[28].mxu1 %v104_v23 }
  0x6e   :  { %1158 = vmatprep.mubr.f32.mxu0 %v71_v24  ;;  %1209 = vmatprep.mubr.f32.mxu1 %v105_v25 }
  0x71   :  { %1159 = vmatmul.mubr.f32.gmra.mrb[30].mxu0 %v72_v26  ;;  %1210 = vmatmul.mubr.f32.gmra.mrb[30].mxu1 %v106_v27  ;;  %v725_v26 = vrot.slane %v550_v17, %v1388_v39  ;;  %v552_v27 = vcombine.high %v536_v2, %v536_v2 }
  0x72   :  { %1161 = vmatprep.mubr.f32.mxu0 %v73_v28 }
  0x73   :  { %v729_v37 = vrot.slane %v552_v27, %v1388_v39 }
  0x75   :  { %1162 = vmatmul.mubr.f32.gmra.mrb[32].mxu0 %v74_v29 }
 0x108   :  { %v1115_v41 = vpop.f32.mrb[0].mxu0  ;;  %v1391_v43 = vpop.f32.mrb[0].mxu1 }
 0x109   :  { %v173_v45 = vpop.f32.mrb[1].mxu0  ;;  %v1397_v48 = vpop.f32.mrb[1].mxu1  ;;  %v863_v52 = vmul.f32 %v1115_v41, %v705_v44 }
 0x10a   :  { %v862_v58 = vmul.f32 %v705_v44, %v173_v45 }
 0x10c   :  { %v1118_v49 = vpop.f32.mrb[2].mxu0  ;;  %v1400_v51 = vpop.f32.mrb[2].mxu1 }
 0x10d   :  { %v865_v53 = vmul.f32 %v1118_v49, %v709_v46  ;;  %v183_v54 = vpop.f32.mrb[3].mxu0  ;;  %v1403_v57 = vpop.f32.mrb[3].mxu1 }
 0x10e   :  { %v864_v59 = vmul.f32 %v709_v46, %v183_v54  ;;  %v570_v54 = vcombine.high %v562_v40, %v562_v40 }
 0x10f   :  { %v957_v60 = vadd.f32 %v865_v53, %v863_v52  ;;  %v733_v52 = vrot.slane %v554_v38, %v1388_v39  ;;  %v578_v53 = vrot.slane %v562_v40, %v1383_v35 }
 0x110   :  { %v926_v61 = vadd.f32 %v864_v59, %v862_v58  ;;  %v1121_v6 = vpop.f32.mrb[4].mxu0  ;;  %v1405_v62 = vpop.f32.mrb[4].mxu1 }
 0x111   :  { %v867_v63 = vmul.f32 %v1121_v6, %v713_v50  ;;  %v193_v0 = vpop.f32.mrb[5].mxu0  ;;  %v1409_v4 = vpop.f32.mrb[5].mxu1  ;;  %v600_v17 = vcombine.high %v578_v53, %v578_v53 }
 0x112   :  { %v866_v5 = vmul.f32 %v713_v50, %v193_v0  ;;  %v737_v0 = vrot.slane %v578_v53, %v1388_v39 }
 0x113   :  { %v958_v8 = vadd.f32 %v957_v60, %v867_v63 }
 0x114   :  { %v927_v9 = vadd.f32 %v926_v61, %v866_v5  ;;  %v1124_v12 = vpop.f32.mrb[6].mxu0  ;;  %v1411_v13 = vpop.f32.mrb[6].mxu1 }
 0x115   :  { %v869_v14 = vmul.f32 %v1124_v12, %v717_v1  ;;  %v203_v15 = vpop.f32.mrb[7].mxu0  ;;  %v1415_v18 = vpop.f32.mrb[7].mxu1 }
 0x116   :  { %v868_v19 = vmul.f32 %v717_v1, %v203_v15  ;;  %v592_v1 = vrot.slane %v570_v54, %v1383_v35 }
 0x117   :  { %v959_v20 = vadd.f32 %v958_v8, %v869_v14 }
 0x118   :  { %v928_v21 = vadd.f32 %v927_v9, %v868_v19  ;;  %v1127_v22 = vpop.f32.mrb[8].mxu0  ;;  %v1417_v23 = vpop.f32.mrb[8].mxu1  ;;  %v555_v19 = vcombine.high %v1343_v7, %v1343_v7 }
 0x119   :  { %v871_v24 = vmul.f32 %v1127_v22, %v721_v16  ;;  %v213_v25 = vpop.f32.mrb[9].mxu0  ;;  %v1420_v28 = vpop.f32.mrb[9].mxu1 }
 0x11a   :  { %v870_v29 = vmul.f32 %v721_v16, %v213_v25  ;;  %v741_v16 = vrot.slane %v592_v1, %v1388_v39 }
 0x11b   :  { %v960_v30 = vadd.f32 %v959_v20, %v871_v24 }
 0x11c   :  { %v929_v31 = vadd.f32 %v928_v21, %v870_v29  ;;  %v1130_v32 = vpop.f32.mrb[10].mxu0  ;;  %v1422_v33 = vpop.f32.mrb[10].mxu1 }
 0x11d   :  { %v873_v34 = vmul.f32 %v1130_v32, %v725_v26  ;;  %v223_v36 = vpop.f32.mrb[11].mxu0  ;;  %v1427_v41 = vpop.f32.mrb[11].mxu1  ;;  %v569_v32 = vrot.slane %v555_v19, %v1383_v35 }
 0x11e   :  { %v872_v42 = vmul.f32 %v725_v26, %v223_v36 }
 0x11f   :  { %v961_v44 = vadd.f32 %v960_v30, %v873_v34  ;;  %v745_v30 = vrot.slane %v600_v17, %v1388_v39 }
 0x120   :  { %v930_v45 = vadd.f32 %v929_v31, %v872_v42  ;;  %v1133_v46 = vpop.f32.mrb[12].mxu0  ;;  %v1429_v47 = vpop.f32.mrb[12].mxu1  ;;  %v602_v31 = vcombine.high %v592_v1, %v592_v1 }
 0x121   :  { %v875_v49 = vmul.f32 %v1133_v46, %v729_v37  ;;  %v233_v50 = vpop.f32.mrb[13].mxu0  ;;  %v1433_v55 = vpop.f32.mrb[13].mxu1  ;;  %v585_v46 = vrot.slane %v569_v32, %v1383_v35 }
 0x122   :  { %v874_v56 = vmul.f32 %v729_v37, %v233_v50 }
 0x123   :  { %v962_v58 = vadd.f32 %v961_v44, %v875_v49  ;;  %v571_v49 = vcombine.high %v569_v32, %v569_v32  ;;  %v601_v17 = vcombine.high %v585_v46, %v585_v46 }
 0x124   :  { %v931_v59 = vadd.f32 %v930_v45, %v874_v56  ;;  %v1136_v60 = vpop.f32.mrb[14].mxu0  ;;  %v1435_v61 = vpop.f32.mrb[14].mxu1  ;;  %v749_v45 = vrot.slane %v602_v31, %v1388_v39 }
 0x125   :  { %v877_v6 = vmul.f32 %v1136_v60, %v733_v52  ;;  %v243_v63 = vpop.f32.mrb[15].mxu0  ;;  %v1439_v2 = vpop.f32.mrb[15].mxu1  ;;  %v761_v32 = vrot.slane %v601_v17, %v1388_v39 }
 0x126   :  { %v876_v3 = vmul.f32 %v733_v52, %v243_v63  ;;  %v599_v63 = vrot.slane %v571_v49, %v1383_v35 }
 0x127   :  { %v963_v5 = vadd.f32 %v962_v58, %v877_v6  ;;  %v753_v6 = vrot.slane %v585_v46, %v1388_v39 }
 0x128   :  { %v932_v8 = vadd.f32 %v931_v59, %v876_v3  ;;  %v1139_v9 = vpop.f32.mrb[16].mxu0  ;;  %v1441_v12 = vpop.f32.mrb[16].mxu1 }
 0x129   :  { %v879_v14 = vmul.f32 %v1139_v9, %v737_v0  ;;  %v253_v15 = vpop.f32.mrb[17].mxu0  ;;  %v1446_v20 = vpop.f32.mrb[17].mxu1 }
 0x12a   :  { %v878_v21 = vmul.f32 %v737_v0, %v253_v15 }
 0x12b   :  { %v964_v22 = vadd.f32 %v963_v5, %v879_v14 }
 0x12c   :  { %v933_v24 = vadd.f32 %v932_v8, %v878_v21  ;;  %v1142_v25 = vpop.f32.mrb[18].mxu0  ;;  %v1448_v26 = vpop.f32.mrb[18].mxu1 }
 0x12d   :  { %v881_v27 = vmul.f32 %v1142_v25, %v741_v16  ;;  %v263_v29 = vpop.f32.mrb[19].mxu0  ;;  %v1452_v34 = vpop.f32.mrb[19].mxu1 }
 0x12e   :  { %v880_v36 = vmul.f32 %v741_v16, %v263_v29  ;;  %v757_v16 = vrot.slane %v599_v63, %v1388_v39 }
 0x12f   :  { %v965_v37 = vadd.f32 %v964_v22, %v881_v27  ;;  %v611_v22 = vrot.slane %v1350_v10, %v1383_v35 }
 0x130   :  { %v934_v7 = vadd.f32 %v933_v24, %v880_v36  ;;  %v1145_v38 = vpop.f32.mrb[20].mxu0  ;;  %v1454_v40 = vpop.f32.mrb[20].mxu1  ;;  %v603_v36 = vcombine.high %v599_v63, %v599_v63 }
 0x131   :  { %v883_v42 = vmul.f32 %v1145_v38, %v745_v30  ;;  %v273_v44 = vpop.f32.mrb[21].mxu0  ;;  %v1458_v50 = vpop.f32.mrb[21].mxu1  ;;  %v619_v38 = vcombine.high %v611_v22, %v611_v22  ;;  %v627_v49 = vrot.slane %v611_v22, %v1383_v35 }
 0x132   :  { %v882_v52 = vmul.f32 %v745_v30, %v273_v44 }
 0x133   :  { %v966_v53 = vadd.f32 %v965_v37, %v883_v42 }
 0x134   :  { %v935_v54 = vadd.f32 %v934_v7, %v882_v52  ;;  %v1148_v56 = vpop.f32.mrb[22].mxu0  ;;  %v1460_v58 = vpop.f32.mrb[22].mxu1  ;;  %v604_v52 = vcombine.high %v1350_v10, %v1350_v10  ;;  %v769_v10 = vrot.slane %v627_v49, %v1388_v39 }
 0x135   :  { %v885_v59 = vmul.f32 %v1148_v56, %v749_v45  ;;  %v283_v60 = vpop.f32.mrb[23].mxu0  ;;  %v1464_v0 = vpop.f32.mrb[23].mxu1  ;;  %v765_v56 = vrot.slane %v603_v36, %v1388_v39 }
 0x136   :  { %v884_v1 = vmul.f32 %v749_v45, %v283_v60 }
 0x137   :  { %v967_v3 = vadd.f32 %v966_v53, %v885_v59 }
 0x138   :  { %v936_v5 = vadd.f32 %v935_v54, %v884_v1  ;;  %v1151_v8 = vpop.f32.mrb[24].mxu0  ;;  %v1466_v9 = vpop.f32.mrb[24].mxu1 }
 0x139   :  { %v887_v14 = vmul.f32 %v1151_v8, %v753_v6  ;;  %v293_v15 = vpop.f32.mrb[25].mxu0  ;;  %v1469_v19 = vpop.f32.mrb[25].mxu1  ;;  %v649_v8 = vcombine.high %v627_v49, %v627_v49 }
 0x13a   :  { %v886_v21 = vmul.f32 %v753_v6, %v293_v15  ;;  %v641_v6 = vrot.slane %v619_v38, %v1383_v35 }
 0x13b   :  { %v968_v24 = vadd.f32 %v967_v3, %v887_v14  ;;  %v618_v14 = vrot.slane %v604_v52, %v1383_v35 }
 0x13c   :  { %v937_v25 = vadd.f32 %v936_v5, %v886_v21  ;;  %v1154_v27 = vpop.f32.mrb[26].mxu0  ;;  %v1473_v29 = vpop.f32.mrb[26].mxu1  ;;  %v773_v22 = vrot.slane %v641_v6, %v1388_v39 }
 0x13d   :  { %v889_v30 = vmul.f32 %v1154_v27, %v757_v16  ;;  %v303_v31 = vpop.f32.mrb[27].mxu0  ;;  %v1476_v37 = vpop.f32.mrb[27].mxu1  ;;  %v634_v36 = vrot.slane %v618_v14, %v1383_v35 }
 0x13e   :  { %v888_v7 = vmul.f32 %v757_v16, %v303_v31 }
 0x13f   :  { %v969_v42 = vadd.f32 %v968_v24, %v889_v30  ;;  %v651_v24 = vcombine.high %v641_v6, %v641_v6  ;;  %v785_v6 = vrot.slane %v634_v36, %v1388_v39 }
 0x140   :  { %v938_v44 = vadd.f32 %v937_v25, %v888_v7  ;;  %v1157_v45 = vpop.f32.mrb[28].mxu0  ;;  %v1478_v46 = vpop.f32.mrb[28].mxu1  ;;  %v620_v25 = vcombine.high %v618_v14, %v618_v14 }
 0x141   :  { %v891_v53 = vmul.f32 %v1157_v45, %v761_v32  ;;  %v313_v54 = vpop.f32.mrb[29].mxu0  ;;  %v1484_v59 = vpop.f32.mrb[29].mxu1  ;;  %v781_v45 = vrot.slane %v651_v24, %v1388_v39 }
 0x142   :  { %v890_v60 = vmul.f32 %v761_v32, %v313_v54  ;;  %v777_v32 = vrot.slane %v649_v8, %v1388_v39  ;;  %v648_v49 = vrot.slane %v620_v25, %v1383_v35 }
 0x143   :  { %v970_v63 = vadd.f32 %v969_v42, %v891_v53  ;;  %v896_v53 = vmul.f32 %v773_v22, %v1397_v48  ;;  %v901_v14 = vmul.f32 %v1405_v62, %v781_v45 }
 0x144   :  { %v939_v1 = vadd.f32 %v938_v44, %v890_v60  ;;  %v1160_v3 = vpop.f32.mrb[30].mxu0  ;;  %v1487_v5 = vpop.f32.mrb[30].mxu1  ;;  %v897_v44 = vmul.f32 %v1391_v43, %v773_v22  ;;  %v899_v60 = vmul.f32 %v1400_v51, %v777_v32  ;;  %v653_v51 = vcombine.high %v1355_v11, %v1355_v11 }
 0x145   :  { %v893_v15 = vmul.f32 %v1160_v3, %v765_v56  ;;  %v323_v16 = vpop.f32.mrb[31].mxu0  ;;  %v1491_v17 = vpop.f32.mrb[31].mxu1  ;;  %v898_v3 = vmul.f32 %v777_v32, %v1403_v57  ;;  %v903_v22 = vmul.f32 %v1411_v13, %v785_v6 }
 0x146   :  { %v892_v21 = vmul.f32 %v765_v56, %v323_v16  ;;  %v660_v56 = vrot.slane %v1355_v11, %v1383_v35  ;;  %v652_v16 = vcombine.high %v648_v49, %v648_v49  ;;  %v667_v13 = vrot.slane %v653_v51, %v1383_v35 }
 0x147   :  { %v971_v27 = vadd.f32 %v970_v63, %v893_v15  ;;  %v650_v63 = vcombine.high %v634_v36, %v634_v36  ;;  %v789_v15 = vrot.slane %v648_v49, %v1388_v39 }
 0x148   :  { %v940_v30 = vadd.f32 %v939_v1, %v892_v21  ;;  %v1163_v31 = vpop.f32.mrb[32].mxu0  ;;  %v668_v8 = vcombine.high %v660_v56, %v660_v56  ;;  %v676_v57 = vrot.slane %v660_v56, %v1383_v35 }
 0x149   :  { %v895_v7 = vmul.f32 %v1163_v31, %v769_v10  ;;  %v333_v38 = vpop.f32.mrb[33].mxu0  ;;  %v793_v24 = vrot.slane %v650_v63, %v1388_v39  ;;  %v905_v31 = vmul.f32 %v1417_v23, %v789_v15  ;;  %v904_v36 = vmul.f32 %v789_v15, %v1420_v28 }
 0x14a   :  { %v894_v42 = vmul.f32 %v769_v10, %v333_v38  ;;  %v900_v10 = vmul.f32 %v781_v45, %v1409_v4  ;;  %v797_v4 = vrot.slane %v652_v16, %v1388_v39  ;;  %v801_v38 = vrot.slane %v676_v57, %v1388_v39 }
 0x14b   :  { %v972_v52 = vadd.f32 %v971_v27, %v895_v7  ;;  %v902_v27 = vmul.f32 %v785_v6, %v1415_v18  ;;  %v907_v7 = vmul.f32 %v1422_v33, %v793_v24  ;;  %v906_v18 = vmul.f32 %v793_v24, %v1427_v41 }
 0x14c   :  { %v941_v54 = vadd.f32 %v940_v30, %v894_v42  ;;  %v690_v30 = vrot.slane %v668_v8, %v1383_v35  ;;  %v909_v23 = vmul.f32 %v1429_v47, %v797_v4  ;;  %v908_v28 = vmul.f32 %v797_v4, %v1433_v55 }
 0x14d   :  { %v973_v1 = vadd.f32 %v972_v52, %v897_v44  ;;  %v698_v44 = vcombine.high %v676_v57, %v676_v57  ;;  %v911_v33 = vmul.f32 %v1435_v61, %v801_v38  ;;  %v910_v41 = vmul.f32 %v801_v38, %v1439_v2 }
 0x14e   :  { %v942_v43 = vadd.f32 %v941_v54, %v896_v53  ;;  %v805_v49 = vrot.slane %v690_v30, %v1388_v39  ;;  %v700_v53 = vcombine.high %v690_v30, %v690_v30  ;;  %v669_v54 = vcombine.high %v667_v13, %v667_v13 }
 0x14f   :  { %v974_v48 = vadd.f32 %v973_v1, %v899_v60  ;;  %v683_v60 = vrot.slane %v667_v13, %v1383_v35  ;;  %v809_v63 = vrot.slane %v698_v44, %v1388_v39 }
 0x150   :  { %v943_v21 = vadd.f32 %v942_v43, %v898_v3  ;;  %v913_v43 = vmul.f32 %v1441_v12, %v805_v49  ;;  %v813_v47 = vrot.slane %v700_v53, %v1388_v39  ;;  %v697_v8 = vrot.slane %v669_v54, %v1383_v35 }
 0x151   :  { %v975_v25 = vadd.f32 %v974_v48, %v901_v14  ;;  %v912_v55 = vmul.f32 %v805_v49, %v1446_v20  ;;  %v817_v15 = vrot.slane %v683_v60, %v1388_v39  ;;  %v915_v61 = vmul.f32 %v1448_v26, %v809_v63 }
 0x152   :  { %v944_v62 = vadd.f32 %v943_v21, %v900_v10  ;;  %v699_v48 = vcombine.high %v683_v60, %v683_v60  ;;  %v701_v10 = vcombine.high %v697_v8, %v697_v8  ;;  %v914_v2 = vmul.f32 %v809_v63, %v1452_v34 }
 0x153   :  { %v976_v32 = vadd.f32 %v975_v25, %v903_v22  ;;  %v917_v12 = vmul.f32 %v1454_v40, %v813_v47  ;;  %v821_v22 = vrot.slane %v697_v8, %v1388_v39  ;;  %v916_v35 = vmul.f32 %v813_v47, %v1458_v50 }
 0x154   :  { %v945_v11 = vadd.f32 %v944_v62, %v902_v27  ;;  %v919_v20 = vmul.f32 %v1460_v58, %v817_v15  ;;  %v825_v57 = vrot.slane %v699_v48, %v1388_v39  ;;  %v829_v26 = vrot.slane %v701_v10, %v1388_v39 }
 0x155   :  { %v977_v42 = vadd.f32 %v976_v32, %v905_v31  ;;  %v918_v62 = vmul.f32 %v817_v15, %v1464_v0  ;;  %v921_v34 = vmul.f32 %v1466_v9, %v821_v22  ;;  %v920_v40 = vmul.f32 %v821_v22, %v1469_v19 }
 0x156   :  { %v946_v45 = vadd.f32 %v945_v11, %v904_v36  ;;  %v923_v32 = vmul.f32 %v1473_v29, %v825_v57  ;;  %v925_v50 = vmul.f32 %v1478_v46, %v829_v26  ;;  %v922_v58 = vmul.f32 %v825_v57, %v1476_v37 }
 0x157   :  { %v978_v52 = vadd.f32 %v977_v42, %v907_v7  ;;  %v924_v11 = vmul.f32 %v829_v26, %v1484_v59 }
 0x158   :  { %v947_v56 = vadd.f32 %v946_v45, %v906_v18 }
 0x159   :  { %v979_v6 = vadd.f32 %v978_v52, %v909_v23 }
 0x15a   :  { %v948_v1 = vadd.f32 %v947_v56, %v908_v28 }
 0x15b   :  { %v980_v3 = vadd.f32 %v979_v6, %v911_v33 }
 0x15c   :  { %v949_v14 = vadd.f32 %v948_v1, %v910_v41 }
 0x15d   :  { %v981_v16 = vadd.f32 %v980_v3, %v913_v43 }
 0x15e   :  { %v950_v21 = vadd.f32 %v949_v14, %v912_v55 }
 0x15f   :  { %v982_v51 = vadd.f32 %v981_v16, %v915_v61 }
 0x160   :  { %v951_v24 = vadd.f32 %v950_v21, %v914_v2 }
 0x161   :  { %v983_v25 = vadd.f32 %v982_v51, %v917_v12 }
 0x162   :  { %v952_v27 = vadd.f32 %v951_v24, %v916_v35 }
 0x163   :  { %v984_v30 = vadd.f32 %v983_v25, %v919_v20 }
 0x164   :  { %v953_v31 = vadd.f32 %v952_v27, %v918_v62 }
 0x165   :  { %v985_v4 = vadd.f32 %v984_v30, %v921_v34 }
 0x166   :  { %v954_v36 = vadd.f32 %v953_v31, %v920_v40 }
 0x167   :  { %v986_v39 = vadd.f32 %v985_v4, %v923_v32 }
 0x168   :  { %v955_v13 = vadd.f32 %v954_v36, %v922_v58 }
 0x169   :  { %v987_v7 = vadd.f32 %v986_v39, %v925_v50 }
 0x16a   :  { %v956_v0 = vadd.f32 %v955_v13, %v924_v11 }
 0x16b   :  { %v989_v38 = vadd.f32 %v1487_v5, %v987_v7 }
 0x16c   :  { %v988_v9 = vadd.f32 %v956_v0, %v1491_v17 }
 0x16d   :  { %v991_v42 = vmax.f32 %v989_v38, 0.0 }
 0x16e   :  { %v990_v19 = vmax.f32 %v988_v9, 0.0 }
 0x16f   :  { %993 = vst [vmem:[%s1559_s2 + $0x8] sm:$0xff] %v991_v42 }
 0x170   :  { %992 = vst [vmem:[%s1559_s2] sm:$0xff] %v990_v19 }
 0x171   :  { %998 = vsyncpa [#allocation3], 1 }

</bundles_post_ra>
